<compile_context>
chip_gen: v6e
topology: v6e:2x2x1
jax: 0.10.0
libtpu: 0.0.40
codegen_flags: <defaults>
</compile_context>

<pallas_src>
import jax
import jax.numpy as jnp
import numpy as np
from jax.experimental import pallas as pl
from jax.experimental.pallas import tpu as pltpu

NUM_HEADS = 4
HIDDEN = 32
HEAD_SIZE = HIDDEN // NUM_HEADS
EPS = 1e-9


def _elu1(t):
    # ELU(alpha=1.0)(t) + 1.0 == the paper's feature map phi(x) = elu(x) + 1
    return jnp.where(t > 0, t, jnp.exp(t) - 1.0) + 1.0


def linear_attention_kernel(x_ref, bias_ref, wqkv_ref, bqkv_ref, wo_ref, bo_ref,
                            mask_ref, o_ref):
    TB, N, H = x_ref.shape
    rows = TB * N

    x2 = x_ref[...].reshape(rows, H)          # (rows, H)
    bias2 = bias_ref[...].reshape(rows, 1)    # (rows, 1)  prior row-mean per node

    # Fused QKV projection: one (rows, H) x (H, 3H) MXU matmul (weights are
    # pre-transposed in the wrapper; bv is folded into bqkv).
    qkv = jnp.dot(x2, wqkv_ref[...], preferred_element_type=jnp.float32) + bqkv_ref[...]
    qf = _elu1(qkv[:, 0:H] + bias2)           # feature_map(q + bias)
    kf = _elu1(qkv[:, H:2 * H])               # feature_map(k)
    vf = _elu1(qkv[:, 2 * H:3 * H])           # feature_map(v)

    mask = mask_ref[...]                      # (H, H) block-diagonal head mask (0/1)

    qf3 = qf.reshape(TB, N, H)
    kf3 = kf.reshape(TB, N, H)
    vf3 = vf.reshape(TB, N, H)

    # Per-batch KV summary: S[b, d, m] = sum_n kf[b,n,d] * vf[b,n,m];
    # the block-diagonal mask keeps only the within-head (d, m) blocks so one
    # (H, H) matmul replaces NUM_HEADS tiny per-head matmuls.
    S = jnp.einsum('bnd,bnm->bdm', kf3, vf3,
                   preferred_element_type=jnp.float32) * mask       # (TB, H, H)

    # Per-head normalizer, broadcast across the lanes of each head via the mask:
    # denom[b,n,m] = sum_{d in head(m)} qf[b,n,d] * ksum[b,d]
    ksum = jnp.sum(kf3, axis=1)                                      # (TB, H)
    ksum_rows = jnp.broadcast_to(ksum[:, None, :], (TB, N, H)).reshape(rows, H)
    denom = jnp.dot(qf * ksum_rows, mask, preferred_element_type=jnp.float32)
    # Exact reciprocal (matches the reference numerics; the approximate EUP
    # reciprocal previously caused a 5e-3-level mismatch).  denom is tiny
    # (rows x H), so the extra refinement cost is negligible.
    z = 1.0 / (denom + EPS)

    attn = jnp.einsum('bnd,bdm->bnm', qf3, S,
                      preferred_element_type=jnp.float32).reshape(rows, H) * z

    # Padding mask (matches reference exactly: computed on the feature-mapped q):
    # a row/head is masked iff all HEAD_SIZE lanes of that head are exactly 0.
    zcount = jnp.dot((qf == 0.0).astype(jnp.float32), mask,
                     preferred_element_type=jnp.float32)
    attn = jnp.where(zcount == float(HEAD_SIZE), 0.0, attn)

    # TODO(synk): att_dropout omitted (identity in eval/inference mode)

    out = jnp.dot(attn, wo_ref[...], preferred_element_type=jnp.float32) + bo_ref[...]
    o_ref[...] = out.reshape(TB, N, H).astype(o_ref.dtype)


def graphormer_linear_attention(x, prior, params, *, batch_block=None):
    B, N, H = x.shape
    assert H == HIDDEN

    if batch_block is None:
        # Fold batches per grid step, but keep >= 2 grid steps when possible so
        # both v7x TensorCores get work: largest divisor of B that is <= B // 2.
        batch_block = max((d for d in range(1, B // 2 + 1) if B % d == 0), default=1)
    assert B % batch_block == 0
    TB = batch_block
    grid = (B // TB,)

    # Reduce the O(N^2) prior outside the kernel: only its row mean is needed.
    bias = jnp.mean(prior, axis=-1, keepdims=True)                   # (B, N, 1)

    # Fuse + pre-transpose projection weights (nn.Linear: y = x @ W^T + b).
    wqkv = jnp.concatenate([params["wq"].T, params["wk"].T, params["wv"].T],
                           axis=1)                                   # (H, 3H)
    zeros_h = jnp.zeros((H,), jnp.float32)
    bqkv = jnp.concatenate([zeros_h, zeros_h, params["bv"]]).reshape(1, 3 * H)
    wo_t = params["wo"].T                                            # (H, H)
    bo = params["bo"].reshape(1, H)

    # Block-diagonal 0/1 head mask: mask[d, m] = 1 iff d and m are in the same head.
    head_id = jnp.arange(H, dtype=jnp.int32) // HEAD_SIZE
    head_mask = (head_id[:, None] == head_id[None, :]).astype(jnp.float32)

    return pl.pallas_call(
        linear_attention_kernel,
        out_shape=jax.ShapeDtypeStruct((B, N, H), jnp.float32),
        grid=grid,
        in_specs=[
            pl.BlockSpec((TB, N, H), lambda b: (b, 0, 0)),   # x (per-batch-block tile)
            pl.BlockSpec((TB, N, 1), lambda b: (b, 0, 0)),   # prior row-mean
            pl.BlockSpec((H, 3 * H), lambda b: (0, 0)),      # fused Wqkv (pre-transposed)
            pl.BlockSpec((1, 3 * H), lambda b: (0, 0)),      # fused bias (0, 0, bv)
            pl.BlockSpec((H, H), lambda b: (0, 0)),          # Wo^T
            pl.BlockSpec((1, H), lambda b: (0, 0)),          # bo
            pl.BlockSpec((H, H), lambda b: (0, 0)),          # block-diagonal head mask
        ],
        out_specs=pl.BlockSpec((TB, N, H), lambda b: (b, 0, 0)),
        compiler_params=pltpu.CompilerParams(dimension_semantics=("parallel",)),
    )(x, bias, wqkv, bqkv, wo_t, bo, head_mask)


def reference(x, prior, params):
    """Pure-JAX reference mirroring the PyTorch forward exactly (eval mode)."""
    B, N, H = x.shape
    fm = lambda t: jnp.where(t > 0, t, jnp.exp(t) - 1.0) + 1.0
    bias = prior.mean(axis=-1)[:, :, None, None]
    q = fm((x @ params["wq"].T).reshape(B, N, NUM_HEADS, HEAD_SIZE) + bias)
    k = fm((x @ params["wk"].T).reshape(B, N, NUM_HEADS, HEAD_SIZE))
    v = fm((x @ params["wv"].T + params["bv"]).reshape(B, N, NUM_HEADS, HEAD_SIZE))
    pad = jnp.all(q == 0, axis=-1)
    kv = jnp.einsum('bnhd,bnhm->bhmd', k, v)
    z = 1.0 / (jnp.einsum('bnhd,bhd->bnh', q, k.sum(axis=1)) + EPS)
    attn = jnp.einsum('bnhd,bhmd,bnh->bnhm', q, kv, z)
    attn = jnp.where(pad[..., None], 0.0, attn)
    return attn.reshape(B, N, H) @ params["wo"].T + params["bo"]


if __name__ == "__main__":
    key = jax.random.PRNGKey(0)
    ks = jax.random.split(key, 8)
    B, N, H = 2, 8, HIDDEN

    x = jax.random.normal(ks[0], (B, N, H), jnp.float32)
    prior = jax.random.normal(ks[1], (B, N, N), jnp.float32)

    scale = 1.0 / np.sqrt(H)
    params = dict(
        wq=jax.random.normal(ks[2], (H, H), jnp.float32) * scale,
        wk=jax.random.normal(ks[3], (H, H), jnp.float32) * scale,
        wv=jax.random.normal(ks[4], (H, H), jnp.float32) * scale,
        bv=jax.random.normal(ks[5], (H,), jnp.float32) * 0.1,
        wo=jax.random.normal(ks[6], (H, H), jnp.float32) * scale,
        bo=jax.random.normal(ks[7], (H,), jnp.float32) * 0.1,
    )

    out = graphormer_linear_attention(x, prior, params)
    out = jax.block_until_ready(out)

    ref = reference(x, prior, params)
    np.testing.assert_allclose(np.asarray(out), np.asarray(ref), rtol=2e-3, atol=2e-3)
    print("KERNEL_OK")
</pallas_src>

<mosaic_0001>
module attributes {stable_mosaic.version = 11 : i64} {
  func.func @linear_attention_kernel(%arg0: i32, %arg1: memref<1x8x32xf32, #tpu.memory_space<vmem>>, %arg2: memref<1x8x1xf32, #tpu.memory_space<vmem>>, %arg3: memref<32x96xf32, #tpu.memory_space<vmem>>, %arg4: memref<1x96xf32, #tpu.memory_space<vmem>>, %arg5: memref<32x32xf32, #tpu.memory_space<vmem>>, %arg6: memref<1x32xf32, #tpu.memory_space<vmem>>, %arg7: memref<32x32xf32, #tpu.memory_space<vmem>>, %arg8: memref<1x8x32xf32, #tpu.memory_space<vmem>>) attributes {dimension_semantics = [#tpu.dimension_semantics<parallel>], iteration_bounds = array<i64: 2>, scalar_prefetch = 0 : i64, scratch_operands = 0 : i64, tpu.core_type = #tpu.core_type<tc>, window_params = [{transform_indices = @transform_0, window_bounds = array<i64: 1, 8, 32>}, {transform_indices = @transform_1, window_bounds = array<i64: 1, 8, 1>}, {pipeline_mode = #tpu.pipeline_mode<synchronous>, transform_indices = @transform_2, window_bounds = array<i64: 32, 96>}, {pipeline_mode = #tpu.pipeline_mode<synchronous>, transform_indices = @transform_3, window_bounds = array<i64: 1, 96>}, {pipeline_mode = #tpu.pipeline_mode<synchronous>, transform_indices = @transform_4, window_bounds = array<i64: 32, 32>}, {pipeline_mode = #tpu.pipeline_mode<synchronous>, transform_indices = @transform_5, window_bounds = array<i64: 1, 32>}, {pipeline_mode = #tpu.pipeline_mode<synchronous>, transform_indices = @transform_6, window_bounds = array<i64: 32, 32>}, {transform_indices = @transform_7, window_bounds = array<i64: 1, 8, 32>}]} {
    %c0 = arith.constant 0 : index
    %c0_0 = arith.constant 0 : index
    %c0_1 = arith.constant 0 : index
    %0 = vector.load %arg1[%c0, %c0_0, %c0_1] : memref<1x8x32xf32, #tpu.memory_space<vmem>>, vector<1x8x32xf32>
    %1 = vector.shape_cast %0 : vector<1x8x32xf32> to vector<8x32xf32>
    %c0_2 = arith.constant 0 : index
    %c0_3 = arith.constant 0 : index
    %c0_4 = arith.constant 0 : index
    %2 = vector.load %arg2[%c0_2, %c0_3, %c0_4] : memref<1x8x1xf32, #tpu.memory_space<vmem>>, vector<1x8x1xf32>
    %3 = vector.shape_cast %2 : vector<1x8x1xf32> to vector<8x1xf32>
    %c0_5 = arith.constant 0 : index
    %c0_6 = arith.constant 0 : index
    %4 = vector.load %arg3[%c0_5, %c0_6] : memref<32x96xf32, #tpu.memory_space<vmem>>, vector<32x96xf32>
    %cst = arith.constant dense<0.000000e+00> : vector<8x96xf32>
    %5 = tpu.matmul %1, %4, %cst {dimension_numbers = #tpu.dot_dimension_numbers<[1], [0], [0], [1], [0, 0, 1, 1], [], []>} : vector<8x32xf32>, vector<32x96xf32>, vector<8x96xf32> -> vector<8x96xf32>
    %c0_7 = arith.constant 0 : index
    %c0_8 = arith.constant 0 : index
    %6 = vector.load %arg4[%c0_7, %c0_8] : memref<1x96xf32, #tpu.memory_space<vmem>>, vector<1x96xf32>
    %7 = vector.broadcast %6 : vector<1x96xf32> to vector<8x96xf32>
    %8 = arith.addf %5, %7 : vector<8x96xf32>
    %9 = vector.extract_strided_slice %8 {offsets = [0, 0], sizes = [8, 32], strides = [1, 1]} : vector<8x96xf32> to vector<8x32xf32>
    %10 = vector.broadcast %3 : vector<8x1xf32> to vector<8x32xf32>
    %11 = arith.addf %9, %10 : vector<8x32xf32>
    %cst_9 = arith.constant 0.000000e+00 : f32
    %12 = vector.broadcast %cst_9 : f32 to vector<8x32xf32>
    %13 = arith.cmpf ogt, %11, %12 : vector<8x32xf32>
    %14 = math.exp %11 : vector<8x32xf32>
    %cst_10 = arith.constant 1.000000e+00 : f32
    %15 = vector.broadcast %cst_10 : f32 to vector<8x32xf32>
    %16 = arith.subf %14, %15 : vector<8x32xf32>
    %17 = arith.select %13, %11, %16 : vector<8x32xi1>, vector<8x32xf32>
    %cst_11 = arith.constant 1.000000e+00 : f32
    %18 = vector.broadcast %cst_11 : f32 to vector<8x32xf32>
    %19 = arith.addf %17, %18 : vector<8x32xf32>
    %20 = vector.extract_strided_slice %8 {offsets = [0, 32], sizes = [8, 32], strides = [1, 1]} : vector<8x96xf32> to vector<8x32xf32>
    %cst_12 = arith.constant 0.000000e+00 : f32
    %21 = vector.broadcast %cst_12 : f32 to vector<8x32xf32>
    %22 = arith.cmpf ogt, %20, %21 : vector<8x32xf32>
    %23 = math.exp %20 : vector<8x32xf32>
    %cst_13 = arith.constant 1.000000e+00 : f32
    %24 = vector.broadcast %cst_13 : f32 to vector<8x32xf32>
    %25 = arith.subf %23, %24 : vector<8x32xf32>
    %26 = arith.select %22, %20, %25 : vector<8x32xi1>, vector<8x32xf32>
    %cst_14 = arith.constant 1.000000e+00 : f32
    %27 = vector.broadcast %cst_14 : f32 to vector<8x32xf32>
    %28 = arith.addf %26, %27 : vector<8x32xf32>
    %29 = vector.extract_strided_slice %8 {offsets = [0, 64], sizes = [8, 32], strides = [1, 1]} : vector<8x96xf32> to vector<8x32xf32>
    %cst_15 = arith.constant 0.000000e+00 : f32
    %30 = vector.broadcast %cst_15 : f32 to vector<8x32xf32>
    %31 = arith.cmpf ogt, %29, %30 : vector<8x32xf32>
    %32 = math.exp %29 : vector<8x32xf32>
    %cst_16 = arith.constant 1.000000e+00 : f32
    %33 = vector.broadcast %cst_16 : f32 to vector<8x32xf32>
    %34 = arith.subf %32, %33 : vector<8x32xf32>
    %35 = arith.select %31, %29, %34 : vector<8x32xi1>, vector<8x32xf32>
    %cst_17 = arith.constant 1.000000e+00 : f32
    %36 = vector.broadcast %cst_17 : f32 to vector<8x32xf32>
    %37 = arith.addf %35, %36 : vector<8x32xf32>
    %c0_18 = arith.constant 0 : index
    %c0_19 = arith.constant 0 : index
    %38 = vector.load %arg7[%c0_18, %c0_19] : memref<32x32xf32, #tpu.memory_space<vmem>>, vector<32x32xf32>
    %39 = vector.shape_cast %19 : vector<8x32xf32> to vector<1x8x32xf32>
    %40 = vector.shape_cast %28 : vector<8x32xf32> to vector<1x8x32xf32>
    %41 = vector.shape_cast %37 : vector<8x32xf32> to vector<1x8x32xf32>
    "tpu.trace_start"() <{level = 10 : i32, message = "bnd,bnm->bdm"}> : () -> ()
    %cst_20 = arith.constant dense<0.000000e+00> : vector<1x32x32xf32>
    %42 = tpu.matmul %40, %41, %cst_20 {dimension_numbers = #tpu.dot_dimension_numbers<[1], [1], [2], [2], [0, 0, 0, 2, 1, 2], [0], [0]>} : vector<1x8x32xf32>, vector<1x8x32xf32>, vector<1x32x32xf32> -> vector<1x32x32xf32>
    "tpu.trace_stop"() : () -> ()
    %43 = vector.shape_cast %38 : vector<32x32xf32> to vector<1x32x32xf32>
    %44 = arith.mulf %42, %43 : vector<1x32x32xf32>
    %cst_21 = arith.constant dense<0.000000e+00> : vector<1x32xf32>
    %45 = vector.multi_reduction <add>, %40, %cst_21 [1] : vector<1x8x32xf32> to vector<1x32xf32>
    %46 = vector.shape_cast %45 : vector<1x32xf32> to vector<1x1x32xf32>
    %47 = vector.shape_cast %46 : vector<1x1x32xf32> to vector<1x1x32xf32>
    %48 = vector.broadcast %47 : vector<1x1x32xf32> to vector<1x8x32xf32>
    %49 = vector.shape_cast %48 : vector<1x8x32xf32> to vector<8x32xf32>
    %50 = arith.mulf %19, %49 : vector<8x32xf32>
    %cst_22 = arith.constant dense<0.000000e+00> : vector<8x32xf32>
    %51 = tpu.matmul %50, %38, %cst_22 {dimension_numbers = #tpu.dot_dimension_numbers<[1], [0], [0], [1], [0, 0, 1, 1], [], []>} : vector<8x32xf32>, vector<32x32xf32>, vector<8x32xf32> -> vector<8x32xf32>
    %cst_23 = arith.constant 9.99999971E-10 : f32
    %52 = vector.broadcast %cst_23 : f32 to vector<8x32xf32>
    %53 = arith.addf %51, %52 : vector<8x32xf32>
    %cst_24 = arith.constant 1.000000e+00 : f32
    %54 = vector.broadcast %cst_24 : f32 to vector<8x32xf32>
    %55 = arith.divf %54, %53 : vector<8x32xf32>
    "tpu.trace_start"() <{level = 10 : i32, message = "bnd,bdm->bnm"}> : () -> ()
    %cst_25 = arith.constant dense<0.000000e+00> : vector<1x8x32xf32>
    %56 = tpu.matmul %39, %44, %cst_25 {dimension_numbers = #tpu.dot_dimension_numbers<[2], [1], [1], [2], [0, 0, 0, 1, 1, 2], [0], [0]>} : vector<1x8x32xf32>, vector<1x32x32xf32>, vector<1x8x32xf32> -> vector<1x8x32xf32>
    "tpu.trace_stop"() : () -> ()
    %57 = vector.shape_cast %56 : vector<1x8x32xf32> to vector<8x32xf32>
    %58 = arith.mulf %57, %55 : vector<8x32xf32>
    %cst_26 = arith.constant 0.000000e+00 : f32
    %59 = vector.broadcast %cst_26 : f32 to vector<8x32xf32>
    %60 = arith.cmpf oeq, %19, %59 : vector<8x32xf32>
    %61 = arith.extui %60 : vector<8x32xi1> to vector<8x32xi32>
    %62 = arith.sitofp %61 : vector<8x32xi32> to vector<8x32xf32>
    %cst_27 = arith.constant dense<0.000000e+00> : vector<8x32xf32>
    %63 = tpu.matmul %62, %38, %cst_27 {dimension_numbers = #tpu.dot_dimension_numbers<[1], [0], [0], [1], [0, 0, 1, 1], [], []>} : vector<8x32xf32>, vector<32x32xf32>, vector<8x32xf32> -> vector<8x32xf32>
    %cst_28 = arith.constant 8.000000e+00 : f32
    %64 = vector.broadcast %cst_28 : f32 to vector<8x32xf32>
    %65 = arith.cmpf oeq, %63, %64 : vector<8x32xf32>
    %cst_29 = arith.constant 0.000000e+00 : f32
    %66 = vector.broadcast %cst_29 : f32 to vector<8x32xf32>
    %67 = arith.select %65, %66, %58 : vector<8x32xi1>, vector<8x32xf32>
    %c0_30 = arith.constant 0 : index
    %c0_31 = arith.constant 0 : index
    %68 = vector.load %arg5[%c0_30, %c0_31] : memref<32x32xf32, #tpu.memory_space<vmem>>, vector<32x32xf32>
    %cst_32 = arith.constant dense<0.000000e+00> : vector<8x32xf32>
    %69 = tpu.matmul %67, %68, %cst_32 {dimension_numbers = #tpu.dot_dimension_numbers<[1], [0], [0], [1], [0, 0, 1, 1], [], []>} : vector<8x32xf32>, vector<32x32xf32>, vector<8x32xf32> -> vector<8x32xf32>
    %c0_33 = arith.constant 0 : index
    %c0_34 = arith.constant 0 : index
    %70 = vector.load %arg6[%c0_33, %c0_34] : memref<1x32xf32, #tpu.memory_space<vmem>>, vector<1x32xf32>
    %71 = vector.broadcast %70 : vector<1x32xf32> to vector<8x32xf32>
    %72 = arith.addf %69, %71 : vector<8x32xf32>
    %73 = vector.shape_cast %72 : vector<8x32xf32> to vector<1x8x32xf32>
    %c0_35 = arith.constant 0 : index
    %c0_36 = arith.constant 0 : index
    %c0_37 = arith.constant 0 : index
    %74 = vector.load %arg8[%c0_35, %c0_36, %c0_37] : memref<1x8x32xf32, #tpu.memory_space<vmem>>, vector<1x8x32xf32>
    tpu.vector_store %arg8[%c0_35, %c0_36, %c0_37], %73 {strides = array<i32>} : memref<1x8x32xf32, #tpu.memory_space<vmem>>, vector<1x8x32xf32>,
    return
  }
  func.func @transform_0(%arg0: i32) -> (i32, i32, i32) {
    %c0_i32 = arith.constant 0 : i32
    %c0_i32_0 = arith.constant 0 : i32
    %c0_i32_1 = arith.constant 0 : i32
    return %arg0, %c0_i32, %c0_i32_0 : i32, i32, i32
  }
  func.func @transform_1(%arg0: i32) -> (i32, i32, i32) {
    %c0_i32 = arith.constant 0 : i32
    %c0_i32_0 = arith.constant 0 : i32
    %c0_i32_1 = arith.constant 0 : i32
    return %arg0, %c0_i32, %c0_i32_0 : i32, i32, i32
  }
  func.func @transform_2(%arg0: i32) -> (i32, i32) {
    %c0_i32 = arith.constant 0 : i32
    %c0_i32_0 = arith.constant 0 : i32
    %c0_i32_1 = arith.constant 0 : i32
    return %c0_i32, %c0_i32_0 : i32, i32
  }
  func.func @transform_3(%arg0: i32) -> (i32, i32) {
    %c0_i32 = arith.constant 0 : i32
    %c0_i32_0 = arith.constant 0 : i32
    %c0_i32_1 = arith.constant 0 : i32
    return %c0_i32, %c0_i32_0 : i32, i32
  }
  func.func @transform_4(%arg0: i32) -> (i32, i32) {
    %c0_i32 = arith.constant 0 : i32
    %c0_i32_0 = arith.constant 0 : i32
    %c0_i32_1 = arith.constant 0 : i32
    return %c0_i32, %c0_i32_0 : i32, i32
  }
  func.func @transform_5(%arg0: i32) -> (i32, i32) {
    %c0_i32 = arith.constant 0 : i32
    %c0_i32_0 = arith.constant 0 : i32
    %c0_i32_1 = arith.constant 0 : i32
    return %c0_i32, %c0_i32_0 : i32, i32
  }
  func.func @transform_6(%arg0: i32) -> (i32, i32) {
    %c0_i32 = arith.constant 0 : i32
    %c0_i32_0 = arith.constant 0 : i32
    %c0_i32_1 = arith.constant 0 : i32
    return %c0_i32, %c0_i32_0 : i32, i32
  }
  func.func @transform_7(%arg0: i32) -> (i32, i32, i32) {
    %c0_i32 = arith.constant 0 : i32
    %c0_i32_0 = arith.constant 0 : i32
    %c0_i32_1 = arith.constant 0 : i32
    return %arg0, %c0_i32, %c0_i32_0 : i32, i32, i32
  }
}

</mosaic_0001>

<bundles_post_ra>
// kernel: tpu_custom_call.1
= control target key start
LH: loop header
LB: loop body
LE: loop exit
PB: predicated region body
PF: predicated region fallthrough
CT: control target
= control target key end

     0   :  { %12 = vsyncpa [#allocation3], 0  ;;  %s1633_s0 = inlined_call_operand.vmem [shape: f32[2,8,32], index: 0, kind: input, shape index: {}]   ;;  %s1634_s1 = inlined_call_operand.vmem [shape: f32[2,8,1], index: 1, kind: input, shape index: {}]   ;;  %s1635_s2 = inlined_call_operand.hbm [shape: f32[32,96], index: 2, kind: input, shape index: {}]   ;;  %s1636_s3 = inlined_call_operand.vmem [shape: f32[1,96], index: 3, kind: input, shape index: {}]   ;;  %s1637_s4 = inlined_call_operand.hbm [shape: f32[32,32], index: 4, kind: input, shape index: {}]   ;;  %s1638_s5 = inlined_call_operand.vmem [shape: f32[1,32], index: 5, kind: input, shape index: {}]   ;;  %s1639_s6 = inlined_call_operand.hbm [shape: f32[32,32], index: 6, kind: input, shape index: {}]   ;;  %s1640_s7 = inlined_call_operand.hbm [shape: f32[2,8,32], index: 7, kind: output, shape index: {}]  }
   0x1   :  { %13 = vsyncpa [#allocation6], 0 }
   0x2   :  { %14 = vsyncpa [#allocation4], 0 }
   0x3   :  { %16 = vsyncpa [#allocation4 + $0x1], 0  ;;  %s1434_s24 = smov 0   ;;  %s1436_s25 = smov 0  }
   0x4   :  { %s1438_s26 = smov 0   ;;  %s1440_s27 = smov 0  }
   0x5 LB: > { %s1455_s28 = sadd.s32 4294967295, %s1381_s27   ;;  %s1026_s29 = sadd.s32 4294967294, %s1381_s27   ;;  %s1381_s27 = sphi %s1440_s27, %s1656_s27   ;;  %s1377_s26 = sphi %s1438_s26, %s1655_s26   ;;  %s1373_s25 = sphi %s1436_s25, %s1654_s25   ;;  %s1369_s24 = sphi %s1434_s24, %s1653_s24  }
   0x6   : > { %s1459_s30 = sadd.s32 1, %s1381_s27   ;;  %s186_s8 = sadd.s32 1, %s1377_s26 }
   0x7   : > { %s183_s9 = ssub.s32 %s1381_s27, %s1459_s30  ;;  %p196_p0 = scmp.ne.s32.totalorder %s1377_s26, %s1373_s25 }
   0x8   : > { %p184_p1 = scmp.eq.s32.totalorder %s183_s9, 0  ;;  %p197_p2 = scmp.eq.s32.totalorder %s1455_s28, 1 }
   0x9   : > { %p202_p3 = scmp.ne.s32.totalorder %s1373_s25, %s1369_s24  ;;  %p203_p4 = scmp.eq.s32.totalorder %s1026_s29, 1 }
   0xa   : > { %s1470_s10 = scalar_select %p184_p1, %s1377_s26, %s186_s8  }
   0xb   : > { %p1472_p5 = por %p197_p2, %p196_p0  ;;  %p1476_p6 = por %p203_p4, %p202_p3 }
   0xc   : > { %p1027_p7 = scmp.ge.s32.totalorder %s1381_s27, 1  ;;  %p210_p8 = scmp.lt.s32.totalorder %s1381_s27, 3 }
   0xd   : > { %s1643_s11 = scalar_select %p1472_p5, 1, 0 }
   0xe   : > { %s1644_s12 = scalar_select %p1476_p6, 1, 0 }
   0xf   : > { %p1641_p9 = scmp.eq.s32.totalorder %s1455_s28, 0  ;;  %p1483_p10 = pnand %p1027_p7, %p210_p8 }
  0x10   : > { %s1383_s14 = smov [#allocation5]   ;;  %s1384_s17 = smov [#allocation2]  }
  0x11   : > { %p1164_p11 = pneg %p1483_p10  ;;  %s238_s15 = sshll.u32 %s1383_s14, 4  ;;  %s239_s15 = int_to_ptr.vmem [resolvable:$true] %s238_s15 }
  0x12   : > { %s222_s18 = sshll.u32 %s1384_s17, 4  ;;  %s1385_s19 = smov [#allocation7]   ;;  %s223_s18 = int_to_ptr.vmem [resolvable:$true] %s222_s18 }
  0x13   : > { %p1491_p12 = pnand %p1641_p9, %p1164_p11  ;;  %s254_s20 = sshll.u32 %s1385_s19, 4  ;;  %s255_s20 = int_to_ptr.vmem [resolvable:$true] %s254_s20 }
  0x14   : > { %s1246_s21 = scalar_lea.vmem %s239_s15, 512  ;;  %p1254_p3 = scmp.lt.s32.totalorder %s239_s15, %s239_s15 }
  0x15   : > { %p1237_p13 = pneg %p1491_p12  ;;  %p1247_p0 = scmp.ne.s32.totalorder %s239_s15, %s1246_s21 }
  0x16   : > { %p1255_p4 = scmp.lt.s32.totalorder %s1246_s21, %s1246_s21 }
  0x17   : > { %p1249_p1 = pnand %p1247_p0, %p1237_p13 }
  0x18   : > { %p1256_p7 = por %p1255_p4, %p1254_p3 }
  0x19   : > { %p1250_p2 = pneg %p1249_p1 }
  0x1b   : > { %p1257_p8 = pnand %p1256_p7, %p1250_p2 }
  0x1d   : > { %1260 = shalt.err (!%p1257_p8)
}
  0x1e   : > { %s1386_s22 = smov 128   ;;  %s1387_s23 = smov 8  }
  0x1f   : > { %1170 = dma.hbm_to_vmem [thread:$0]  (!%p1491_p12), %s1637_s4, 512, %s239_s15, [#allocation6], %s1386_s22, %s1386_s22, %s1387_s23  }
  0x20   : > { %s1272_s9 = scalar_lea.vmem %s223_s18, 512  ;;  %p1280_p9 = scmp.lt.s32.totalorder %s223_s18, %s223_s18 }
  0x21   : > { %p1273_p11 = scmp.ne.s32.totalorder %s223_s18, %s1272_s9  ;;  %p1281_p6 = scmp.lt.s32.totalorder %s1272_s9, %s1272_s9 }
  0x23   : > { %p1275_p0 = pnand %p1273_p11, %p1237_p13  ;;  %p1282_p3 = por %p1281_p6, %p1280_p9 }
  0x25   : > { %p1276_p1 = pneg %p1275_p0 }
  0x27   : > { %p1283_p2 = pnand %p1282_p3, %p1276_p1 }
  0x29   : > { %1286 = shalt.err (!%p1283_p2)
}
  0x2a   : > { %1167 = dma.hbm_to_vmem [thread:$0]  (!%p1491_p12), %s1635_s2, 512, %s223_s18, [#allocation3], %s1386_s22, %s1386_s22, %s1387_s23  }
  0x2b   : > { %s1298_s15 = scalar_lea.vmem %s255_s20, 512  ;;  %p1306_p11 = scmp.lt.s32.totalorder %s255_s20, %s255_s20 }
  0x2c   : > { %p1299_p4 = scmp.ne.s32.totalorder %s255_s20, %s1298_s15  ;;  %p1307_p0 = scmp.lt.s32.totalorder %s1298_s15, %s1298_s15 }
  0x2e   : > { %p1301_p7 = pnand %p1299_p4, %p1237_p13  ;;  %p1308_p5 = por %p1307_p0, %p1306_p11 }
  0x30   : > { %p1302_p8 = pneg %p1301_p7 }
  0x32   : > { %p1309_p6 = pnand %p1308_p5, %p1302_p8 }
  0x34   : > { %1312 = shalt.err (!%p1309_p6)
}
  0x35   : > { %1173 = dma.hbm_to_vmem [thread:$0]  (!%p1491_p12), %s1639_s6, 512, %s255_s20, [#allocation6], %s1386_s22, %s1386_s22, %s1387_s23  }
  0x36   : > { %284 = sbr.rel (%p1483_p10) target bundleno = 1146 (0x47a), region = 48  ;;  %p1647_p9 = scmp.eq.s32.totalorder (!%p1483_p10), %s1455_s28, 0 }
  0x3b   : > { %1356 = dma.done.wait (%p1647_p9), [#allocation3], 512   ;;  %p1648_p13 = pmov %p1647_p9 }
  0x3c   : > { %p1649_p1 = pmov %p1647_p9 }
  0x3d   : > { %1358 = vsyncadd (%p1648_p13), [#allocation3], 4294966784 }
  0x3e   : > { %1360 = dma.done.wait (%p1649_p1), [#allocation6], 1024   ;;  %p1650_p5 = pmov %p1649_p1 }
  0x3f   : > { %p327_p3 = scmp.lt.s32.totalorder %s1455_s28, 1  ;;  %v1388_v0 = vmov 0.0   ;;  %vm1389_vm0 = vmmov 0   ;;  %v340_v1 = vld [vmem:[#allocation2 + $0x18] sm:$0xff]  ;;  %v339_v2 = vld [vmem:[#allocation2 + $0x10] sm:$0xff]  ;;  %v338_v3 = vld [vmem:[#allocation2 + $0x8] sm:$0xff] }
  0x40   : > { %1362 = vsyncadd (%p1650_p5), [#allocation6], 4294966272  ;;  %1087 = vmatprep.subr.mxu0 %v1388_v0  ;;  %1095 = vmatprep.mubr.msk.f32.mxu0 %vm1389_vm0, %v1388_v0  ;;  %v337_v4 = vld [vmem:[#allocation2] sm:$0xff]  ;;  %vm348_vm1 = vcmask 261120   ;;  %vm585_vm3 = vcmask 523520   ;;  %s1390_s8 = smov 96  }
  0x41   : > { %s1536_s13 = scalar_select %p327_p3, %s1455_s28, 1  ;;  %1088 = vmatpush3.msra.mxu0 %v340_v1  ;;  %v1039_v6 = vld [vmem:[%s1636_s3] ss:$0 sm:$0xff]  ;;  %v1391_v17 = vmov 0   ;;  %vm483_vm4 = vcmask 64512   ;;  %v443_v27 = vld [vmem:[#allocation7 + $0x18] sm:$0xff] }
  0x42   : > { %1089 = vmatprep.subr.mxu0 %v1388_v0  ;;  %1228 = vset.pattern.permute.xlu0 %v1391_v17  ;;  %s1392_s9 = smov 64   ;;  %v442_v29 = vld [vmem:[#allocation7 + $0x10] sm:$0xff]  ;;  %v441_v30 = vld [vmem:[#allocation7 + $0x8] sm:$0xff]  ;;  %v440_v32 = vld [vmem:[#allocation7] sm:$0xff]  ;;  %s324_s19 = sand.u32 1, %s1373_s25  }
  0x43   : > { %s1037_s16 = sshll.u32 %s1536_s13, 3  ;;  %1090 = vmatpush3.msra.mxu0 %v339_v2  ;;  %v828_v52 = vld [vmem:[#allocation5 + $0x18] sm:$0xff]  ;;  %v827_v53 = vld [vmem:[#allocation5 + $0x10] sm:$0xff]  ;;  %v826_v58 = vld [vmem:[#allocation5 + $0x8] sm:$0xff]  ;;  %s1036_s21 = sshll.u32 %s324_s19, 3 }
  0x44   : > { %s330_s22 = scalar_lea.vmem %s1633_s0, %s1037_s16  ;;  %1091 = vmatprep.subr.mxu0 %v1388_v0  ;;  %s334_s15 = scalar_lea.vmem %s1634_s1, %s1037_s16  ;;  %v825_v59 = vld [vmem:[#allocation5] sm:$0xff] }
  0x45   : > { %1092 = vmatpush3.msra.mxu0 %v338_v3  ;;  %v335_v5 = vld [vmem:[%s330_s22] sm:$0xff]  ;;  %s1054_s18 = sshll.u32 %s1455_s28, 7  ;;  %s326_s20 = scalar_lea.vmem [#allocation8], %s1036_s21 }
  0x46   : > { %1093 = vmatprep.subr.mxu0 %v1388_v0  ;;  %v336_v25 = vld [vmem:[%s334_s15] sm:$0xff]  ;;  %s924_s22 = sshll.u32 %s326_s20, 4  ;;  %p1651_p12 = scmp.ne.s32.totalorder %s1643_s11, 0  ;;  %s925_s22 = int_to_ptr.vmem [resolvable:$true] %s924_s22 }
  0x47   : > { %1094 = vmatpush3.msra.mxu0 %v337_v4  ;;  %v1051_v3 = vld [vmem:[%s1638_s5] ss:$0 sm:$0xff]  ;;  %s1313_s14 = scalar_lea.vmem %s925_s22, 128  ;;  %s1393_s28 = smov [#allocation8]  }
  0x48   : > { %1096 = vmatmul.mubr.msk.f32.vlgmr.msra.gmra.mxu0 %vm348_vm1, %v335_v5  ;;  %1117 = vmatprep.subr.mxu0 %v1388_v0  ;;  %p1314_p10 = scmp.ne.s32.totalorder %s925_s22, %s1313_s14  ;;  %s1317_s17 = sshll.u32 %s1393_s28, 4  ;;  %s1318_s17 = int_to_ptr.vmem [resolvable:$false] %s1317_s17 }
  0x49   : > { %1125 = vmatprep.mubr.msk.f32.mxu0 %vm1389_vm0, %v1388_v0  ;;  %s1319_s15 = scalar_lea.vmem %s1318_s17, 256  ;;  %p1320_p7 = scmp.lt.s32.totalorder %s925_s22, %s1318_s17 }
  0x4a   : > { %p1315_p2 = pnand %p1314_p10, %p1651_p12  ;;  %p1321_p8 = scmp.lt.s32.totalorder %s1319_s15, %s1313_s14 }
  0x4c   : > { %p1316_p4 = pneg %p1315_p2  ;;  %p1322_p11 = por %p1321_p8, %p1320_p7 }
  0x4e   : > { %p1323_p0 = pnand %p1322_p11, %p1316_p4 }
 0x108   : > { %v418_v7 = vpop.f32.mrf.mxu0 }
 0x109   : > { %v419_v8 = vadd.f32 %v1039_v6, %v418_v7 }
 0x10a   : > { %v1097_v9 = vpop.f32.mrf.mxu0 }
 0x10b   : > { %v435_v10 = vmul.f32 1.442695, %v419_v8  ;;  %vm434_vm2 = vcmp.gt.f32.partialorder %v419_v8, 0.0 }
 0x10d   : > { %1229 = vpow2.f32 %v435_v10 }
 0x11a   : > { %v1230_v11 = vpop.eup %1229 }
 0x11b   : > { %v1042_v12 = vadd.f32 -1.0, %v1230_v11 }
 0x11d   : > { %v438_v13 = vsel %vm434_vm2, %v419_v8, %v1042_v12 }
 0x11e   : > { %v439_v14 = vadd.f32 1.0, %v438_v13 }
 0x120   : > { %445 = vrot.lane.b32.xlu0 %v439_v14, %s1390_s8  ;;  %v586_v15 = vsel %vm585_vm3, %v439_v14, 0.0 }
 0x121   : > { %v587_v16 = vrot.slane %v586_v15, 4 }
 0x123   : > { %v588_v18 = vadd.f32 %v587_v16, %v586_v15 }
 0x124   : > { %480 = vrot.lane.b32.xlu0 %v439_v14, %s1392_s9  ;;  %s911_s9 = scalar_lea.sflag [#allocation4], %s324_s19 }
 0x125   : > { %v589_v19 = vrot.slane %v588_v18, 2 }
 0x127   : > { %v590_v20 = vadd.f32 %v589_v19, %v588_v18 }
 0x129   : > { %v591_v21 = vrot.slane %v590_v20, 1 }
 0x12b   : > { %v592_v22 = vadd.f32 %v591_v21, %v590_v20 }
 0x12d   : > { %594 = vrot.lane.b32.xlu0 %v592_v22, %s1390_s8  ;;  %s1597_s8 = scalar_lea.hbm %s1640_s7, %s1054_s18 }
 0x192   : > { %v446_v23 = vpop.permute.xlu0 %445 }
 0x193   : > { %448 = vxpose.xlu1.b32.start.end [1/1] (short) (narrow) %v446_v23, 32 }
 0x196   : > { %v481_v24 = vpop.permute.xlu0 %480 }
 0x197   : > { %1098 = vmatprep.subr.mxu1 %v481_v24 }
 0x198   : > { %1099 = vmatpush3.msra.mxu1 %v481_v24 }
 0x199   : > { %1106 = vmatprep.subr.mxu1 %v1388_v0 }
 0x19f   : > { %v595_v41 = vpop.permute.xlu0 %594 }
 0x1b1   : > { %1227 = vset.pattern.permute.xlu1 %v1391_v17 }
 0x1bd   : > { %424 = vperm.xlu1 %1227, %v336_v25  }
 0x20f   : > { %v464_v26 = vpop.trf.xlu1 }
 0x210   : > { %1100 = vmatprep.mubr.msk.f32.mxu1 %vm483_vm4, %v464_v26 }
 0x213   : > { %v465_v28 = vpop.trf.xlu1 }
 0x214   : > { %1101 = vmatmul.mubr.msk.f32.vlgmr.msra.gmra.mxu1 %vm483_vm4, %v465_v28 }
 0x215   : > { %1107 = vmatpush3.msra.mxu1 %v443_v27 }
 0x216   : > { %1108 = vmatprep.subr.mxu1 %v1388_v0 }
 0x217   : > { %v466_v31 = vpop.trf.xlu1  ;;  %1109 = vmatpush3.msra.mxu1 %v442_v29 }
 0x218   : > { %1103 = vmatprep.mubr.msk.f32.mxu1 %vm483_vm4, %v466_v31  ;;  %1110 = vmatprep.subr.mxu1 %v1388_v0 }
 0x219   : > { %1111 = vmatpush3.msra.mxu1 %v441_v30 }
 0x21a   : > { %1112 = vmatprep.subr.mxu1 %v1388_v0 }
 0x21b   : > { %v467_v33 = vpop.trf.xlu1  ;;  %1113 = vmatpush3.msra.mxu1 %v440_v32 }
 0x21c   : > { %1104 = vmatmul.mubr.msk.f32.gmra.mxu1 %vm483_vm4, %v467_v33  ;;  %1128 = vmatprep.subr.mxu1 %v1388_v0 }
 0x21d   : > { %1114 = vmatprep.mubr.msk.f32.mxu1 %vm1389_vm0, %v1388_v0 }
 0x238   : > { %v425_v34 = vpop.permute.xlu1 %424 }
 0x239   : > { %v427_v35 = vadd.f32 %v425_v34, %v419_v8 }
 0x23b   : > { %v429_v36 = vmul.f32 1.442695, %v427_v35  ;;  %vm428_vm5 = vcmp.gt.f32.partialorder %v427_v35, 0.0 }
 0x23d   : > { %1231 = vpow2.f32 %v429_v36 }
 0x24a   : > { %v1232_v37 = vpop.eup %1231 }
 0x24b   : > { %v1041_v38 = vadd.f32 -1.0, %v1232_v37 }
 0x24d   : > { %v432_v39 = vsel %vm428_vm5, %v427_v35, %v1041_v38 }
 0x24e   : > { %v433_v40 = vadd.f32 1.0, %v432_v39 }
 0x250   : > { %v597_v42 = vmul.f32 %v595_v41, %v433_v40  ;;  %vm747_vm6 = vcmp.eq.f32.partialorder %v433_v40, 0.0 }
 0x251   : > { %v1049_v43 = vsel %vm747_vm6, 1.0, %v1388_v0 }
 0x252   : > { %1115 = vmatmul.mubr.msk.f32.vlgmr.msra.gmra.mxu1 %vm348_vm1, %v597_v42 }
 0x253   : > { %1129 = vmatpush3.msra.mxu1 %v443_v27  ;;  %1136 = vmatprep.mubr.msk.f32.mxu1 %vm1389_vm0, %v1388_v0 }
 0x254   : > { %1130 = vmatprep.subr.mxu1 %v1388_v0 }
 0x255   : > { %1131 = vmatpush3.msra.mxu1 %v442_v29 }
 0x256   : > { %1132 = vmatprep.subr.mxu1 %v1388_v0 }
 0x257   : > { %1133 = vmatpush3.msra.mxu1 %v441_v30 }
 0x258   : > { %1134 = vmatprep.subr.mxu1 %v1388_v0 }
 0x259   : > { %1135 = vmatpush3.msra.mxu1 %v440_v32 }
 0x25a   : > { %1137 = vmatmul.mubr.msk.f32.vlgmr.msra.gmra.mxu1 %vm348_vm1, %v1049_v43 }
 0x2d4   : > { %v1102_v44 = vpop.f32.mrf.mxu1 }
 0x2d5   : > { %v582_v50 = vmul.f32 %v1102_v44, %v441_v30 }
 0x2d6   : > { %v562_v45 = vpop.f32.mrf.mxu1 }
 0x2d7   : > { %v581_v51 = vmul.f32 %v562_v45, %v440_v32 }
 0x2dc   : > { %v1105_v46 = vpop.f32.mrf.mxu1 }
 0x2dd   : > { %v584_v47 = vmul.f32 %v1105_v46, %v443_v27 }
 0x2de   : > { %v572_v48 = vpop.f32.mrf.mxu1 }
 0x2df   : > { %v583_v49 = vmul.f32 %v572_v48, %v442_v29  ;;  %1118 = vmatpush3.msra.mxu0 %v584_v47 }
 0x2e0   : > { %1119 = vmatprep.subr.mxu0 %v1388_v0 }
 0x2e1   : > { %1120 = vmatpush3.msra.mxu0 %v583_v49 }
 0x2e2   : > { %1121 = vmatprep.subr.mxu0 %v1388_v0 }
 0x2e3   : > { %1122 = vmatpush3.msra.mxu0 %v582_v50 }
 0x2e4   : > { %1123 = vmatprep.subr.mxu0 %v1388_v0 }
 0x2e5   : > { %1124 = vmatpush3.msra.mxu0 %v581_v51 }
 0x2e6   : > { %1126 = vmatmul.mubr.msk.f32.vlgmr.msra.gmra.mxu0 %vm348_vm1, %v433_v40  ;;  %1139 = vmatprep.subr.mxu0 %v1388_v0 }
 0x2e7   : > { %1140 = vmatpush3.msra.mxu0 %v828_v52  ;;  %1147 = vmatprep.mubr.msk.f32.mxu0 %vm1389_vm0, %v1388_v0 }
 0x2e8   : > { %1141 = vmatprep.subr.mxu0 %v1388_v0 }
 0x2e9   : > { %1142 = vmatpush3.msra.mxu0 %v827_v53 }
 0x2ea   : > { %1143 = vmatprep.subr.mxu0 %v1388_v0 }
 0x2eb   : > { %1144 = vmatpush3.msra.mxu0 %v826_v58 }
 0x2ec   : > { %1145 = vmatprep.subr.mxu0 %v1388_v0 }
 0x2ed   : > { %1146 = vmatpush3.msra.mxu0 %v825_v59 }
 0x312   : > { %v667_v54 = vpop.f32.mrf.mxu1 }
 0x313   : > { %v668_v60 = vadd.f32 1e-09, %v667_v54 }
 0x314   : > { %v1116_v55 = vpop.f32.mrf.mxu1 }
 0x315   : > { %1233 = vrcp.f32 %v668_v60 }
 0x31a   : > { %v819_v56 = vpop.f32.mrf.mxu1 }
 0x31b   : > { %vm823_vm7 = vcmp.eq.f32.partialorder %v819_v56, 8.0 }
 0x31c   : > { %v1138_v57 = vpop.f32.mrf.mxu1 }
 0x322   : > { %v1234_v61 = vpop.eup %1233 }
 0x3a6   : > { %v742_v62 = vpop.f32.mrf.mxu0 }
 0x3a7   : > { %v746_v63 = vmul.f32 %v1234_v61, %v742_v62 }
 0x3a8   : > { %v1127_v1 = vpop.f32.mrf.mxu0 }
 0x3a9   : > { %v824_v2 = vsel %vm823_vm7, 0.0, %v746_v63 }
 0x3aa   : > { %1148 = vmatmul.mubr.msk.f32.vlgmr.msra.gmra.mxu0 %vm348_vm1, %v824_v2 }
 0x46a   : > { %v905_v0 = vpop.f32.mrf.mxu0 }
 0x46b   : > { %v906_v4 = vadd.f32 %v1051_v3, %v905_v0 }
 0x46c   : > { %v1149_v5 = vpop.f32.mrf.mxu0 }
 0x46d   : > { %909 = vst.msk [vmem:[%s326_s20] sm:$0xff] %vm348_vm1, %v906_v4 }
 0x46e   : > { %1326 = shalt.err (!%p1323_p0)
}
 0x46f   : > { %s1327_s21 = scalar_lea.hbm %s1597_s8, 128  ;;  %s1331_s16 = scalar_lea.hbm %s1640_s7, 256 }
 0x470   : > { %p1328_p6 = scmp.ne.s32.totalorder %s1597_s8, %s1327_s21  ;;  %p1332_p1 = scmp.lt.s32.totalorder %s1597_s8, %s1640_s7 }
 0x471   : > { %p1333_p5 = scmp.lt.s32.totalorder %s1331_s16, %s1327_s21 }
 0x472   : > { %p1329_p9 = pnand %p1328_p6, %p1651_p12 }
 0x473   : > { %p1334_p3 = por %p1333_p5, %p1332_p1 }
 0x474   : > { %p1330_p13 = pneg %p1329_p9 }
 0x476   : > { %p1335_p10 = pnand %p1334_p3, %p1330_p13 }
 0x478   : > { %1338 = shalt.err (!%p1335_p10)
}
 0x479   : > { %1162 = dma.vmem_to_hbm [thread:$0]  (%p1651_p12), %s925_s22, 128, %s1597_s8, %s911_s9  }
 0x47a PF: > { %p1184_p2 = scmp.ge.s32.totalorder %s1381_s27, 2  ;;  %s936_s23 = sand.u32 1, %s1369_s24  }
 0x47b   : > { %p1652_p4 = scmp.ne.s32.totalorder %s1644_s12, 0  ;;  %s937_s29 = scalar_lea.sflag [#allocation4], %s936_s23 }
 0x47d   : > { %p1175_p7 = pnand %p1184_p2, %p1652_p4 }
 0x47f   : > { %p1176_p8 = pneg %p1175_p7 }
 0x481   : > { %1364 = dma.done.wait (%p1176_p8), %s937_s29, 128  }
 0x482   : > { %1366 = vsyncadd (%p1176_p8), %s937_s29, 4294967168  ;;  %p19_p11 = scmp.ge.s32.totalorder %s1459_s30, 4   ;;  %s1653_s24 = smov %s1373_s25 }
 0x483   : > { %s1654_s25 = smov %s1377_s26  ;;  %s1655_s26 = smov %s1470_s10 }
 0x484   : > { %s1656_s27 = smov %s1459_s30  ;;  %21 = sbr.rel (!%p19_p11) target bundleno = 5 (0x5), region = 99 }
 0x489   :  { %942 = vsyncpa [#allocation3], 1 }
 0x48a   :  { %944 = vsyncpa [#allocation3 + $0x1], 1 }
 0x48b   :  { %945 = vsyncpa [#allocation6], 1 }
 0x48c   :  { %946 = vsyncpa [#allocation4], 1 }
 0x48d   :  { %948 = vsyncpa [#allocation4 + $0x1], 1 }

</bundles_post_ra>
